<compile_context>
chip_gen: v7x
topology: tpu7x:2x2x1
jax: 0.10.0
libtpu: 0.0.40
codegen_flags: <defaults>
</compile_context>

<pallas_src>
import jax
import jax.numpy as jnp
from jax.experimental import pallas as pl
from jax.experimental.pallas import tpu as pltpu


def attention3d_kernel(x_ref, ws_ref, wc_c_ref, wc_h_ref, out_ref):
    # x_ref:    (Bb, T, D)   block of hidden states
    # ws_ref:   (D, D)       score weight, oriented so  v = h_t @ Ws  (== Ws^T h_t)
    # wc_c_ref: (D, dense)   context_vector weight, context half, pre-transposed
    # wc_h_ref: (D, dense)   context_vector weight, h_t half, pre-transposed
    # out_ref:  (Bb, dense)
    x = x_ref[...]                                   # (Bb, T, D), native dtype
    h_t = x[:, -1, :]                                # (Bb, D)   last time step

    # v = Ws^T h_t  ==  h_t @ Ws  — single MXU GEMM with f32 accumulation.
    v = jnp.dot(h_t, ws_ref[...], preferred_element_type=jnp.float32)   # (Bb, D) f32

    xf = x.astype(jnp.float32)                       # no-op for f32 inputs

    # score[b, t] = <x[b, t, :], v[b, :]>  — lane-dense (Bb, T), lane reduce over D.
    score = jnp.sum(xf * v[:, None, :], axis=-1)     # (Bb, T) f32

    # Softmax over T (last / lane axis), f32 statistics.
    m = jnp.max(score, axis=-1, keepdims=True)
    e = jnp.exp(score - m)
    attn = e / jnp.sum(e, axis=-1, keepdims=True)    # (Bb, T) f32

    # context[b, :] = sum_t attn[b, t] * x[b, t, :]  — sublane reduce over T.
    context = jnp.sum(attn[:, :, None] * xf, axis=1)  # (Bb, D) f32

    # cat([context, h_t]) @ W_ctx^T  ==  context @ wc_c + h_t @ wc_h
    # (both halves pre-transposed in the wrapper; no in-kernel .T).
    pre = (jnp.dot(context, wc_c_ref[...], preferred_element_type=jnp.float32)
           + jnp.dot(h_t, wc_h_ref[...], preferred_element_type=jnp.float32))

    out_ref[...] = jnp.tanh(pre).astype(out_ref.dtype)


def attention3d_block(hidden_states, w_score, w_ctx, dense_size, block_b=None):
    B, T, D = hidden_states.shape
    assert w_score.shape == (D, D)
    assert w_ctx.shape == (dense_size, 2 * D)

    # Pre-orient weights outside the kernel (one-time, plain-JAX glue):
    #   v   = h_t @ w_score                       (w_score passed untouched)
    #   pre = context @ wc_c_t + h_t @ wc_h_t     (both halves transposed to (D, dense))
    wc_c_t = jnp.asarray(w_ctx[:, :D].T)          # (D, dense)
    wc_h_t = jnp.asarray(w_ctx[:, D:].T)          # (D, dense)

    # Choose the largest batch block (<=128) that evenly divides B so every grid
    # step sees a full tile (amortizes per-step overhead, fills the MXU M dim,
    # and keeps the (Bb, dense) output store unmasked).
    if block_b is None:
        block_b = 1
        for cand in range(1, min(B, 128) + 1):
            if B % cand == 0:
                block_b = cand
    assert B % block_b == 0

    itemsize = jnp.dtype(hidden_states.dtype).itemsize
    cost = pl.CostEstimate(
        flops=B * (2 * D * D + 4 * T * D + 4 * D * dense_size),
        transcendentals=B * (T + dense_size),
        bytes_accessed=(B * T * D + D * D + 2 * D * dense_size
                        + B * dense_size) * itemsize,
    )

    return pl.pallas_call(
        attention3d_kernel,
        out_shape=jax.ShapeDtypeStruct((B, dense_size), hidden_states.dtype),
        grid_spec=pltpu.PrefetchScalarGridSpec(
            num_scalar_prefetch=0,
            grid=(B // block_b,),
            in_specs=[
                pl.BlockSpec((block_b, T, D), lambda b: (b, 0, 0)),
                # Constant index_map -> weights stay resident in VMEM across steps.
                pl.BlockSpec((D, D), lambda b: (0, 0)),
                pl.BlockSpec((D, dense_size), lambda b: (0, 0)),
                pl.BlockSpec((D, dense_size), lambda b: (0, 0)),
            ],
            out_specs=pl.BlockSpec((block_b, dense_size), lambda b: (b, 0)),
        ),
        compiler_params=pltpu.CompilerParams(
            dimension_semantics=("parallel",)),
        cost_estimate=cost,
    )(hidden_states, w_score, wc_c_t, wc_h_t)


def attention3d_ref(hidden_states, w_score, w_ctx):
    # Pure-JAX reference mirroring the PyTorch forward exactly.
    sfp = jnp.einsum("btd,ed->bte", hidden_states, w_score)           # Linear: x @ W^T
    h_t = hidden_states[:, -1, :]                                     # (B, D)
    score = jnp.einsum("btd,bd->bt", sfp, h_t)                        # (B, T)
    attn = jax.nn.softmax(score, axis=1)                              # (B, T)
    context = jnp.einsum("btd,bt->bd", hidden_states, attn)           # (B, D)
    pre = jnp.concatenate([context, h_t], axis=1)                     # (B, 2D)
    return jnp.tanh(pre @ w_ctx.T)                                    # (B, dense)


if __name__ == "__main__":
    B, T, D = 2, 8, 32
    DENSE = 128

    key = jax.random.PRNGKey(0)
    k_x, k_ws, k_wc = jax.random.split(key, 3)

    hidden_states = jax.random.normal(k_x, (B, T, D), dtype=jnp.float32)
    # Deterministic synthetic parameters (PyTorch Linear weight layout: (out, in)).
    w_score = jax.random.normal(k_ws, (D, D), dtype=jnp.float32) * 0.1
    w_ctx = jax.random.normal(k_wc, (DENSE, 2 * D), dtype=jnp.float32) * 0.1

    out = attention3d_block(hidden_states, w_score, w_ctx, DENSE)
    out = jax.block_until_ready(out)

    ref = attention3d_ref(hidden_states, w_score, w_ctx)
    assert out.shape == (B, DENSE)
    assert jnp.allclose(out, ref, atol=1e-5, rtol=1e-5), "mismatch vs reference"

    print("KERNEL_OK")
</pallas_src>

<mosaic_0001>
module attributes {stable_mosaic.version = 11 : i64} {
  func.func @attention3d_kernel(%arg0: i32, %arg1: memref<2x8x32xf32, #tpu.memory_space<vmem>>, %arg2: memref<32x32xf32, #tpu.memory_space<vmem>>, %arg3: memref<32x128xf32, #tpu.memory_space<vmem>>, %arg4: memref<32x128xf32, #tpu.memory_space<vmem>>, %arg5: memref<2x128xf32, #tpu.memory_space<vmem>>) attributes {dimension_semantics = [#tpu.dimension_semantics<parallel>], iteration_bounds = array<i64: 1>, scalar_prefetch = 0 : i64, scratch_operands = 0 : i64, tpu.core_type = #tpu.core_type<tc>, window_params = [{transform_indices = @transform_0, window_bounds = array<i64: 2, 8, 32>}, {pipeline_mode = #tpu.pipeline_mode<synchronous>, transform_indices = @transform_1, window_bounds = array<i64: 32, 32>}, {pipeline_mode = #tpu.pipeline_mode<synchronous>, transform_indices = @transform_2, window_bounds = array<i64: 32, 128>}, {pipeline_mode = #tpu.pipeline_mode<synchronous>, transform_indices = @transform_3, window_bounds = array<i64: 32, 128>}, {transform_indices = @transform_4, window_bounds = array<i64: 2, 128>}]} {
    %c0 = arith.constant 0 : index
    %c0_0 = arith.constant 0 : index
    %c0_1 = arith.constant 0 : index
    %0 = vector.load %arg1[%c0, %c0_0, %c0_1] : memref<2x8x32xf32, #tpu.memory_space<vmem>>, vector<2x8x32xf32>
    %1 = vector.extract_strided_slice %0 {offsets = [0, 7, 0], sizes = [2, 1, 32], strides = [1, 1, 1]} : vector<2x8x32xf32> to vector<2x1x32xf32>
    %2 = vector.shape_cast %1 : vector<2x1x32xf32> to vector<2x32xf32>
    %c0_2 = arith.constant 0 : index
    %c0_3 = arith.constant 0 : index
    %3 = vector.load %arg2[%c0_2, %c0_3] : memref<32x32xf32, #tpu.memory_space<vmem>>, vector<32x32xf32>
    %cst = arith.constant dense<0.000000e+00> : vector<2x32xf32>
    %4 = tpu.matmul %2, %3, %cst {dimension_numbers = #tpu.dot_dimension_numbers<[1], [0], [0], [1], [0, 0, 1, 1], [], []>} : vector<2x32xf32>, vector<32x32xf32>, vector<2x32xf32> -> vector<2x32xf32>
    %5 = vector.shape_cast %4 : vector<2x32xf32> to vector<2x1x32xf32>
    %6 = vector.broadcast %5 : vector<2x1x32xf32> to vector<2x8x32xf32>
    %7 = arith.mulf %0, %6 : vector<2x8x32xf32>
    %cst_4 = arith.constant dense<0.000000e+00> : vector<2x8xf32>
    %8 = vector.multi_reduction <add>, %7, %cst_4 [2] : vector<2x8x32xf32> to vector<2x8xf32>
    %cst_5 = arith.constant dense<0xFF800000> : vector<2xf32>
    %9 = vector.multi_reduction <maximumf>, %8, %cst_5 [1] : vector<2x8xf32> to vector<2xf32>
    %10 = vector.shape_cast %9 : vector<2xf32> to vector<2x1xf32>
    %11 = vector.broadcast %10 : vector<2x1xf32> to vector<2x8xf32>
    %12 = arith.subf %8, %11 : vector<2x8xf32>
    %13 = math.exp %12 : vector<2x8xf32>
    %cst_6 = arith.constant dense<0.000000e+00> : vector<2xf32>
    %14 = vector.multi_reduction <add>, %13, %cst_6 [1] : vector<2x8xf32> to vector<2xf32>
    %15 = vector.shape_cast %14 : vector<2xf32> to vector<2x1xf32>
    %16 = vector.broadcast %15 : vector<2x1xf32> to vector<2x8xf32>
    %17 = arith.divf %13, %16 : vector<2x8xf32>
    %18 = vector.shape_cast %17 : vector<2x8xf32> to vector<2x8x1xf32>
    %19 = vector.broadcast %18 : vector<2x8x1xf32> to vector<2x8x32xf32>
    %20 = arith.mulf %19, %0 : vector<2x8x32xf32>
    %cst_7 = arith.constant dense<0.000000e+00> : vector<2x32xf32>
    %21 = vector.multi_reduction <add>, %20, %cst_7 [1] : vector<2x8x32xf32> to vector<2x32xf32>
    %c0_8 = arith.constant 0 : index
    %c0_9 = arith.constant 0 : index
    %22 = vector.load %arg3[%c0_8, %c0_9] : memref<32x128xf32, #tpu.memory_space<vmem>>, vector<32x128xf32>
    %cst_10 = arith.constant dense<0.000000e+00> : vector<2x128xf32>
    %23 = tpu.matmul %21, %22, %cst_10 {dimension_numbers = #tpu.dot_dimension_numbers<[1], [0], [0], [1], [0, 0, 1, 1], [], []>} : vector<2x32xf32>, vector<32x128xf32>, vector<2x128xf32> -> vector<2x128xf32>
    %c0_11 = arith.constant 0 : index
    %c0_12 = arith.constant 0 : index
    %24 = vector.load %arg4[%c0_11, %c0_12] : memref<32x128xf32, #tpu.memory_space<vmem>>, vector<32x128xf32>
    %cst_13 = arith.constant dense<0.000000e+00> : vector<2x128xf32>
    %25 = tpu.matmul %2, %24, %cst_13 {dimension_numbers = #tpu.dot_dimension_numbers<[1], [0], [0], [1], [0, 0, 1, 1], [], []>} : vector<2x32xf32>, vector<32x128xf32>, vector<2x128xf32> -> vector<2x128xf32>
    %26 = arith.addf %23, %25 : vector<2x128xf32>
    %27 = math.tanh %26 : vector<2x128xf32>
    %c0_14 = arith.constant 0 : index
    %c0_15 = arith.constant 0 : index
    %28 = vector.load %arg5[%c0_14, %c0_15] : memref<2x128xf32, #tpu.memory_space<vmem>>, vector<2x128xf32>
    tpu.vector_store %arg5[%c0_14, %c0_15], %27 {strides = array<i32>} : memref<2x128xf32, #tpu.memory_space<vmem>>, vector<2x128xf32>,
    return
  }
  func.func @transform_0(%arg0: i32) -> (i32, i32, i32) {
    %c0_i32 = arith.constant 0 : i32
    %c0_i32_0 = arith.constant 0 : i32
    %c0_i32_1 = arith.constant 0 : i32
    return %arg0, %c0_i32, %c0_i32_0 : i32, i32, i32
  }
  func.func @transform_1(%arg0: i32) -> (i32, i32) {
    %c0_i32 = arith.constant 0 : i32
    %c0_i32_0 = arith.constant 0 : i32
    %c0_i32_1 = arith.constant 0 : i32
    return %c0_i32, %c0_i32_0 : i32, i32
  }
  func.func @transform_2(%arg0: i32) -> (i32, i32) {
    %c0_i32 = arith.constant 0 : i32
    %c0_i32_0 = arith.constant 0 : i32
    %c0_i32_1 = arith.constant 0 : i32
    return %c0_i32, %c0_i32_0 : i32, i32
  }
  func.func @transform_3(%arg0: i32) -> (i32, i32) {
    %c0_i32 = arith.constant 0 : i32
    %c0_i32_0 = arith.constant 0 : i32
    %c0_i32_1 = arith.constant 0 : i32
    return %c0_i32, %c0_i32_0 : i32, i32
  }
  func.func @transform_4(%arg0: i32) -> (i32, i32) {
    %c0_i32 = arith.constant 0 : i32
    %c0_i32_0 = arith.constant 0 : i32
    return %arg0, %c0_i32 : i32, i32
  }
}

</mosaic_0001>

<bundles_post_ra>
// kernel: tpu_custom_call.1
= control target key start
LH: loop header
LB: loop body
LE: loop exit
PB: predicated region body
PF: predicated region fallthrough
CT: control target
= control target key end

     0   :  { %9 = vsyncpa [#allocation3], 0  ;;  %s843_s0 = inlined_call_operand.hbm [shape: f32[2,8,32], index: 0, kind: input, shape index: {}]   ;;  %s844_s1 = inlined_call_operand.hbm [shape: f32[32,32], index: 1, kind: input, shape index: {}]   ;;  %s845_s2 = inlined_call_operand.hbm [shape: f32[32,128], index: 2, kind: input, shape index: {}]   ;;  %s846_s3 = inlined_call_operand.hbm [shape: f32[32,128], index: 3, kind: input, shape index: {}]   ;;  %s847_s4 = inlined_call_operand.hbm [shape: f32[2,128], index: 4, kind: output, shape index: {}]  }
   0x1   :  { %10 = vsyncpa [#allocation6], 0 }
   0x2   :  { %11 = vsyncpa [#allocation9], 0 }
   0x3   :  { %12 = vsyncpa [#allocation4], 0  ;;  %s681_s15 = smov [#allocation5]   ;;  %s682_s17 = smov [#allocation2]  }
   0x4   :  { %s30_s16 = sshll.u32 %s681_s15, 4  ;;  %s18_s18 = sshll.u32 %s682_s17, 4  ;;  %s31_s16 = int_to_ptr.vmem [resolvable:$true] %s30_s16  ;;  %s718_s18 = int_to_ptr.vmem [resolvable:$true] %s18_s18 }
   0x5   :  { %s563_s21 = scalar_lea.hbm %s844_s1, 512 }
   0x6   :  { %p564_p0 = scmp.ne.s32.totalorder %s844_s1, %s563_s21  ;;  %p567_p1 = scmp.lt.u32.totalorder %s563_s21, %s844_s1 }
   0x8   :  { %p569_p2 = pnand %p567_p1, %p564_p0 }
   0xa   :  { %572 = shalt.err (!%p569_p2)
}
   0xb   :  { %s573_s26 = scalar_lea.vmem %s31_s16, 512  ;;  %p578_p4 = scmp.lt.s32.totalorder %s31_s16, %s31_s16 }
   0xc   :  { %p574_p3 = scmp.ne.s32.totalorder %s31_s16, %s573_s26  ;;  %p579_p5 = scmp.lt.s32.totalorder %s573_s26, %s573_s26 }
   0xe   :  { %p580_p6 = por %p579_p5, %p578_p4 }
  0x10   :  { %p581_p7 = pnand %p580_p6, %p574_p3 }
  0x12   :  { %584 = shalt.err (!%p581_p7)
}
  0x13   :  { %s683_s27 = smov 128   ;;  %s684_s28 = smov 8  }
  0x14   :  { %36 = dma.hbm_to_vmem [thread:$0]  %s844_s1, 512, %s31_s16, [#allocation6], %s683_s27, %s683_s27, %s684_s28  }
  0x15   :  { %s585_s7 = scalar_lea.hbm %s843_s0, 256 }
  0x16   :  { %p586_p8 = scmp.ne.s32.totalorder %s843_s0, %s585_s7  ;;  %p589_p9 = scmp.lt.u32.totalorder %s585_s7, %s843_s0 }
  0x18   :  { %p591_p10 = pnand %p589_p9, %p586_p8 }
  0x1a   :  { %594 = shalt.err (!%p591_p10)
}
  0x1b   :  { %s595_s12 = scalar_lea.vmem %s718_s18, 256  ;;  %p600_p12 = scmp.lt.s32.totalorder %s718_s18, %s718_s18 }
  0x1c   :  { %p596_p11 = scmp.ne.s32.totalorder %s718_s18, %s595_s12  ;;  %p601_p13 = scmp.lt.s32.totalorder %s595_s12, %s595_s12 }
  0x1e   :  { %p602_p0 = por %p601_p13, %p600_p12 }
  0x20   :  { %p603_p1 = pnand %p602_p0, %p596_p11 }
  0x22   :  { %606 = shalt.err (!%p603_p1)
}
  0x23   :  { %24 = dma.hbm_to_vmem [thread:$0]  %s843_s0, 256, %s718_s18, [#allocation3], %s683_s27, %s683_s27, %s684_s28  }
  0x24   :  { %s685_s14 = smov [#allocation7]   ;;  %s686_s16 = smov [#allocation8]  }
  0x25   :  { %s42_s15 = sshll.u32 %s685_s14, 4  ;;  %s54_s17 = sshll.u32 %s686_s16, 4  ;;  %s43_s15 = int_to_ptr.vmem [resolvable:$true] %s42_s15  ;;  %s755_s17 = int_to_ptr.vmem [resolvable:$true] %s54_s17 }
  0x26   :  { %s607_s21 = scalar_lea.hbm %s845_s2, 512 }
  0x27   :  { %p608_p2 = scmp.ne.s32.totalorder %s845_s2, %s607_s21  ;;  %p611_p3 = scmp.lt.u32.totalorder %s607_s21, %s845_s2 }
  0x29   :  { %p613_p4 = pnand %p611_p3, %p608_p2 }
  0x2b   :  { %616 = shalt.err (!%p613_p4)
}
  0x2c   :  { %s617_s0 = scalar_lea.vmem %s43_s15, 512  ;;  %p622_p6 = scmp.lt.s32.totalorder %s43_s15, %s43_s15 }
  0x2d   :  { %p618_p5 = scmp.ne.s32.totalorder %s43_s15, %s617_s0  ;;  %p623_p7 = scmp.lt.s32.totalorder %s617_s0, %s617_s0 }
  0x2f   :  { %p624_p8 = por %p623_p7, %p622_p6 }
  0x31   :  { %p625_p9 = pnand %p624_p8, %p618_p5 }
  0x33   :  { %628 = shalt.err (!%p625_p9)
}
  0x34   :  { %48 = dma.hbm_to_vmem [thread:$0]  %s845_s2, 512, %s43_s15, [#allocation6], %s683_s27, %s683_s27, %s684_s28  }
  0x35   :  { %s629_s5 = scalar_lea.hbm %s846_s3, 512 }
  0x36   :  { %p630_p10 = scmp.ne.s32.totalorder %s846_s3, %s629_s5  ;;  %p633_p11 = scmp.lt.u32.totalorder %s629_s5, %s846_s3 }
  0x38   :  { %p635_p12 = pnand %p633_p11, %p630_p10 }
  0x3a   :  { %638 = shalt.err (!%p635_p12)
}
  0x3b   :  { %s639_s10 = scalar_lea.vmem %s755_s17, 512  ;;  %p644_p0 = scmp.lt.s32.totalorder %s755_s17, %s755_s17 }
  0x3c   :  { %p640_p13 = scmp.ne.s32.totalorder %s755_s17, %s639_s10  ;;  %p645_p1 = scmp.lt.s32.totalorder %s639_s10, %s639_s10 }
  0x3e   :  { %p646_p2 = por %p645_p1, %p644_p0 }
  0x40   :  { %p647_p3 = pnand %p646_p2, %p640_p13 }
  0x42   :  { %650 = shalt.err (!%p647_p3)
}
  0x43   :  { %60 = dma.hbm_to_vmem [thread:$0]  %s846_s3, 512, %s755_s17, [#allocation9], %s683_s27, %s683_s27, %s684_s28  }
  0x44   :  { %673 = dma.done.wait [#allocation3], 256  }
  0x45   :  { %674 = vsyncadd [#allocation3], 4294967040 }
  0x46   :  { %675 = dma.done.wait [#allocation6], 1024  }
  0x47   :  { %676 = vsyncadd [#allocation6], 4294966272 }
  0x48   :  { %677 = dma.done.wait [#allocation9], 512  }
  0x49   :  { %678 = vsyncadd [#allocation9], 4294966784  ;;  %v687_v0 = vmov 0.0|0.0   ;;  %vm688_vm0 = vmmov 0   ;;  %v689_v1 = vmov 0.0   ;;  %v75_v2 = vld [vmem:[#allocation5] sm:$0xff]  ;;  %v162_v15 = vlaneseq }
  0x4a   :  { %519 = vmatprep.subr.bf16.mxu0 %v687_v0  ;;  %494 = vmatprep.mubr.msk.f32.mxu0 %vm688_vm0, %v689_v1  ;;  %v76_v3 = vld [vmem:[#allocation5 + $0x8] sm:$0xff]  ;;  %v77_v4 = vld [vmem:[#allocation5 + $0x10] sm:$0xff]  ;;  %v78_v6 = vld [vmem:[#allocation5 + $0x18] sm:$0xff]  ;;  %vm83_vm1 = vcmask 1041409   ;;  %vm85_vm2 = vcmask 261120   ;;  %vm213_vm3 = vcmask 58368  }
  0x4b   :  { %525 = vmatprep.subr.bf16.mxu1 %v687_v0  ;;  %505 = vmatprep.mubr.msk.f32.mxu1 %vm688_vm0, %v689_v1  ;;  %v520_v5 = vpack.c.bf16 %v76_v3, %v75_v2  ;;  %v798_v7 = vld [vmem:[#allocation2] sm:$0xff]  ;;  %v800_v8 = vld [vmem:[#allocation2 + $0x8] sm:$0xff]  ;;  %v523_v9 = vpack.c.bf16 %v78_v6, %v77_v4  ;;  %v690_v13 = vmov 1966171168   ;;  %v163_v17 = vshrl.u32 %v162_v15, 7  ;;  %v300_v2 = vld [vmem:[#allocation8] sm:$0xff] }
  0x4c   :  { %v81_v10 = vrot.slane %v798_v7, 7  ;;  %v82_v11 = vrot.slane %v800_v8, 6  ;;  %v160_v14 = vunpack.c.l.s4 %v690_v13  ;;  %v202_v32 = vand.u32 127, %v162_v15  ;;  %v301_v3 = vld [vmem:[#allocation8 + $0x8] sm:$0xff]  ;;  %v303_v6 = vld [vmem:[#allocation8 + $0x18] sm:$0xff]  ;;  %s692_s3 = smov [#allocation10]  }
  0x4d   :  { %521 = vmatpush3.bf16.msra.mxu0 %v520_v5  ;;  %v183_v22 = vsub.s32 0, %v163_v17  ;;  %v691_v40 = vmov 0   ;;  %v224_v41 = vsub.s32 1, %v163_v17  ;;  %v526_v4 = vpack.c.bf16 %v301_v3, %v300_v2  ;;  %v302_v5 = vld [vmem:[#allocation8 + $0x10] sm:$0xff]  ;;  %v299_v15 = vld [vmem:[#allocation7 + $0x18] sm:$0xff]  ;;  %s457_s27 = sshll.u32 %s692_s3, 4  ;;  %s458_s27 = int_to_ptr.vmem [resolvable:$true] %s457_s27 }
  0x4e   :  { %522 = vmatprep.subr.bf16.mxu0 %v687_v0  ;;  %v806_v12 = vsel %vm83_vm1, %v82_v11, %v81_v10  ;;  %v161_v16 = vunpack.c.0.s8 %v160_v14  ;;  %v205_v34 = vsub.s32 %v202_v32, %v163_v17  ;;  %552 = vset.pattern.permute.xlu0 %v691_v40  ;;  %v296_v10 = vld [vmem:[#allocation7] sm:$0xff]  ;;  %v297_v11 = vld [vmem:[#allocation7 + $0x8] sm:$0xff]  ;;  %v298_v14 = vld [vmem:[#allocation7 + $0x10] sm:$0xff]  ;;  %s651_s28 = scalar_lea.vmem %s458_s27, 32  ;;  %p656_p5 = scmp.lt.s32.totalorder %s458_s27, %s458_s27 }
  0x4f   :  { %551 = vset.pattern.permute.xlu1 %v691_v40  ;;  %527 = vmatpush3.bf16.msra.mxu1 %v526_v4  ;;  %v532_v13 = vpack.c.bf16 %v297_v11, %v296_v10  ;;  %p652_p4 = scmp.ne.s32.totalorder %s458_s27, %s651_s28  ;;  %p657_p6 = scmp.lt.s32.totalorder %s651_s28, %s651_s28 }
  0x50   :  { %v164_v18 = vsub.s32 %v161_v16, %v163_v17  ;;  %528 = vmatprep.subr.bf16.mxu1 %v687_v0  ;;  %v535_v16 = vpack.c.bf16 %v299_v15, %v298_v14 }
  0x51   :  { %524 = vmatpush3.bf16.msra.mxu0 %v523_v9  ;;  %v529_v9 = vpack.c.bf16 %v303_v6, %v302_v5  ;;  %p658_p7 = por %p657_p6, %p656_p5 }
  0x53   :  { %530 = vmatpush3.bf16.msra.mxu1 %v529_v9  ;;  %p659_p8 = pnand %p658_p7, %p652_p4 }
  0x54   :  { %495 = vmatmul.mubr.msk.f32.vlgmr.msra.gmra.mrb[0].mxu0 %vm85_vm2, %v806_v12  ;;  %531 = vmatprep.subr.bf16.mxu1 %v687_v0 }
  0x56   :  { %506 = vmatmul.mubr.msk.f32.vlgmr.msra.gmra.mrb[0].mxu1 %vm85_vm2, %v806_v12 }
  0x57   :  { %533 = vmatpush3.bf16.msra.mxu1 %v532_v13  ;;  %516 = vmatprep.mubr.msk.f32.mxu1 %vm688_vm0, %v689_v1 }
  0x58   :  { %534 = vmatprep.subr.bf16.mxu1 %v687_v0 }
  0x5b   :  { %536 = vmatpush3.bf16.msra.mxu1 %v535_v16 }
 0x127   :  { %v154_v19 = vpop.f32.mrb[0].mxu0 }
 0x128   :  { %v165_v20 = vrot.slane %v154_v19, %v164_v18  ;;  %v496_v21 = vpop.f32.mrb[1].mxu0 }
 0x12a   :  { %v166_v23 = vcombine.high %v165_v20, %v165_v20  ;;  %v173_v24 = vrot.slane %v165_v20, %v164_v18 }
 0x12c   :  { %v180_v25 = vrot.slane %v166_v23, %v164_v18  ;;  %v184_v26 = vrot.slane %v173_v24, %v183_v22 }
 0x12e   :  { %v191_v27 = vmul.f32 %v184_v26, %v798_v7  ;;  %v188_v28 = vrot.slane %v180_v25, %v183_v22 }
 0x130   :  { %v193_v29 = vsel %vm85_vm2, %v191_v27, 0.0  ;;  %v192_v30 = vmul.f32 %v188_v28, %v800_v8 }
 0x131   :  { %194 = vadd.xlane.f32.xlu0 %v193_v29 }
 0x132   :  { %v196_v31 = vsel %vm85_vm2, %v192_v30, 0.0 }
 0x135   :  { %197 = vadd.xlane.f32.xlu0 %v196_v31 }
 0x1be   :  { %v195_v33 = vpop.xlane.xlu0 %194 }
 0x1bf   :  { %v206_v36 = vrot.slane %v195_v33, %v205_v34 }
 0x1c2   :  { %v198_v35 = vpop.xlane.xlu0 %197 }
 0x1c3   :  { %v210_v37 = vrot.slane %v198_v35, %v205_v34 }
 0x1c5   :  { %v211_v38 = vsel %vm83_vm1, %v210_v37, %v206_v36 }
 0x1c6   :  { %v214_v39 = vsel %vm213_vm3, %v211_v38, -inf }
 0x1c7   :  { %215 = vmax.xlane.f32.xlu1 %v214_v39 }
 0x254   :  { %v216_v42 = vpop.xlane.xlu1 %215 }
 0x255   :  { %v221_v43 = vrot.slane %v216_v42, %v183_v22  ;;  %v225_v44 = vrot.slane %v216_v42, %v224_v41 }
 0x257   :  { %v228_v45 = vsub.f32 %v195_v33, %v221_v43  ;;  %v229_v46 = vsub.f32 %v198_v35, %v225_v44 }
 0x259   :  { %v230_v47 = vmul.f32 1.442695, %v228_v45  ;;  %v232_v48 = vmul.f32 1.442695, %v229_v46 }
 0x25b   :  { %553 = vpow2.f32 %v230_v47 }
 0x25c   :  { %555 = vpow2.f32 %v232_v48 }
 0x265   :  { %v554_v49 = vpop.eup %553 }
 0x266   :  { %v556_v50 = vpop.eup %555  ;;  %237 = vperm.xlu1 %551, %v554_v49  }
 0x267   :  { %240 = vperm.xlu0 %552, %v556_v50  }
 0x2e5   :  { %v238_v51 = vpop.permute.xlu1 %237 }
 0x2e6   :  { %v241_v52 = vpop.permute.xlu0 %240  ;;  %v245_v53 = vrot.slane %v238_v51, %v205_v34 }
 0x2e7   :  { %v249_v54 = vrot.slane %v241_v52, %v205_v34 }
 0x2e9   :  { %v250_v55 = vsel %vm83_vm1, %v249_v54, %v245_v53 }
 0x2ea   :  { %v252_v56 = vsel %vm213_vm3, %v250_v55, 0.0 }
 0x2eb   :  { %253 = vadd.xlane.f32.xlu1 %v252_v56 }
 0x378   :  { %v254_v57 = vpop.xlane.xlu1 %253 }
 0x379   :  { %v259_v58 = vrot.slane %v254_v57, %v183_v22  ;;  %v263_v59 = vrot.slane %v254_v57, %v224_v41 }
 0x37b   :  { %557 = vrcp.f32 %v259_v58 }
 0x37c   :  { %559 = vrcp.f32 %v263_v59 }
 0x385   :  { %v558_v60 = vpop.eup %557 }
 0x386   :  { %v267_v61 = vmul.f32 %v558_v60, %v554_v49  ;;  %v560_v62 = vpop.eup %559 }
 0x387   :  { %v269_v63 = vmul.f32 %v560_v62, %v556_v50 }
 0x388   :  { %272 = vperm.xlu0 %552, %v267_v61  }
 0x38c   :  { %277 = vperm.xlu0 %552, %v269_v63  }
 0x407   :  { %v273_v17 = vpop.permute.xlu0 %272 }
 0x408   :  { %v280_v18 = vmul.f32 %v273_v17, %v798_v7 }
 0x40a   :  { %v282_v19 = vsel %vm85_vm2, %v280_v18, 0.0 }
 0x40b   :  { %v283_v20 = vrot.slane %v282_v19, 4  ;;  %v278_v21 = vpop.permute.xlu0 %277 }
 0x40c   :  { %v281_v22 = vmul.f32 %v278_v21, %v800_v8 }
 0x40d   :  { %v284_v12 = vadd.f32 %v283_v20, %v282_v19 }
 0x40e   :  { %v289_v23 = vsel %vm85_vm2, %v281_v22, 0.0 }
 0x40f   :  { %v285_v24 = vrot.slane %v284_v12, 2  ;;  %v290_v1 = vrot.slane %v289_v23, 4 }
 0x411   :  { %v286_v25 = vadd.f32 %v285_v24, %v284_v12  ;;  %v291_v0 = vadd.f32 %v290_v1, %v289_v23 }
 0x413   :  { %v292_v26 = vrot.slane %v291_v0, 2  ;;  %v287_v27 = vrot.slane %v286_v25, 1 }
 0x415   :  { %v293_v28 = vadd.f32 %v292_v26, %v291_v0  ;;  %v288_v30 = vadd.f32 %v287_v27, %v286_v25 }
 0x417   :  { %v294_v29 = vrot.slane %v293_v28, 1 }
 0x419   :  { %v295_v31 = vadd.f32 %v294_v29, %v293_v28 }
 0x41b   :  { %v376_v7 = vsel %vm83_vm1, %v295_v31, %v288_v30 }
 0x41c   :  { %517 = vmatmul.mubr.msk.f32.vlgmr.msra.gmra.mrb[0].mxu1 %vm85_vm2, %v376_v7 }
 0x4ef   :  { %v445_v32 = vpop.f32.mrb[0].mxu1 }
 0x4f0   :  { %561 = vtanh.f32 %v445_v32  ;;  %v518_v8 = vpop.f32.mrb[1].mxu1 }
 0x4fa   :  { %v562_v33 = vpop.eup %561 }
 0x4fb   :  { %450 = vst [vmem:[#allocation10] sm:$0x3] %v562_v33 }
 0x4fc   :  { %662 = shalt.err (!%p659_p8)
}
 0x4fd   :  { %s663_s13 = scalar_lea.hbm %s847_s4, 32 }
 0x4fe   :  { %p664_p9 = scmp.ne.s32.totalorder %s847_s4, %s663_s13  ;;  %p667_p10 = scmp.lt.u32.totalorder %s663_s13, %s847_s4 }
 0x500   :  { %p669_p11 = pnand %p667_p10, %p664_p9 }
 0x502   :  { %672 = shalt.err (!%p669_p11)
}
 0x503   :  { %460 = dma.vmem_to_hbm [thread:$0]  %s458_s27, 32, %s847_s4, [#allocation4]  }
 0x504   :  { %679 = dma.done.wait [#allocation4], 32  }
 0x505   :  { %680 = vsyncadd [#allocation4], 4294967264 }
 0x506   :  { %464 = vsyncpa [#allocation3], 1 }
 0x507   :  { %465 = vsyncpa [#allocation6], 1 }
 0x508   :  { %466 = vsyncpa [#allocation9], 1 }
 0x509   :  { %467 = vsyncpa [#allocation4], 1 }

</bundles_post_ra>
